<compile_context>
chip_gen: v7x
topology: tpu7x:2x2x1
jax: 0.10.0
libtpu: 0.0.40
codegen_flags: <defaults>
</compile_context>

<pallas_src>
import functools

import jax
import jax.numpy as jnp
from jax.experimental import pallas as pl
from jax.experimental.pallas import tpu as pltpu


def _round_up(n, m):
    return ((n + m - 1) // m) * m


def _survnet_kernel(x_ref, xe_ref, wbx_ref, wbe_ref, bb_ref, w1_ref, b1_ref,
                    w2_ref, b2_ref, out_ref):
    """Fused SurvNet forward for one batch tile.

    x_ref/xe_ref: (TILE_B, DX)/(TILE_B, DE) f32 activations (bf16 cast in-kernel)
    wbx/wbe/w1/w2: bf16 weights (lane-dense padded), VMEM-resident across steps
    bb/b1/b2:      f32 biases (lane-dense padded)
    out_ref:       (TILE_B, N_PAD) bf16, lane-dense (N_PAD % 128 == 0)
    """
    x = x_ref[...].astype(jnp.bfloat16)
    xe = xe_ref[...].astype(jnp.bfloat16)

    # backbone: H = relu(x @ Wb_x + x_ext @ Wb_e + bb) -- two small-K dots into
    # the same f32 accumulator (same vmatmul count as one fused-K dot).
    h = (jnp.dot(x, wbx_ref[...], preferred_element_type=jnp.float32)
         + jnp.dot(xe, wbe_ref[...], preferred_element_type=jnp.float32)
         + bb_ref[...])
    h = jnp.maximum(h, 0.0)

    # out_layer hop 1: Linear(dim_in, dim_in) + ReLU (+ Dropout: identity in eval)
    h1 = jnp.dot(h.astype(jnp.bfloat16), w1_ref[...],
                 preferred_element_type=jnp.float32) + b1_ref[...]
    h1 = jnp.maximum(h1, 0.0)

    # out_layer final: Linear(dim_in, dim_out_padded) + Sigmoid (out_scale='sigmoid')
    z = jnp.dot(h1.astype(jnp.bfloat16), w2_ref[...],
                preferred_element_type=jnp.float32) + b2_ref[...]
    out_ref[...] = jax.nn.sigmoid(z).astype(out_ref.dtype)


def pack_params(params, *, lane=128):
    """One-time weight packing: bf16 casts + lane-dense padding of dim_in/dim_out.

    Call once (outside the per-inference path); pass the packed pytree to
    survnet_forward.  Zero padding is exact for this network (relu(0)=0, zero
    weight rows/cols contribute nothing to retained outputs).
    """
    dim_x, dim_in = params["wb_x"].shape
    dim_ext = params["wb_e"].shape[0]
    dim_out = params["w2"].shape[1]
    di = _round_up(dim_in, lane)
    no = _round_up(dim_out, lane)

    def pad2(w, rows, cols):
        return jnp.zeros((rows, cols), jnp.float32).at[:w.shape[0], :w.shape[1]].set(w)

    packed = {
        "wbx": pad2(params["wb_x"], dim_x, di).astype(jnp.bfloat16),
        "wbe": pad2(params["wb_e"], dim_ext, di).astype(jnp.bfloat16),
        "bb":  pad2(params["bb"], 1, di),
        "w1":  pad2(params["w1"], di, di).astype(jnp.bfloat16),
        "b1":  pad2(params["b1"], 1, di),
        "w2":  pad2(params["w2"], di, no).astype(jnp.bfloat16),
        "b2":  pad2(params["b2"], 1, no),
    }
    return packed, dim_out


@functools.partial(jax.jit, static_argnames=("dim_out", "tile_b"))
def survnet_forward(x, x_ext, packed, *, dim_out, tile_b=512):
    """Batch-tiled, weight-resident SurvNet forward (eval mode)."""
    B, dx = x.shape
    de = x_ext.shape[1]
    di = packed["w1"].shape[0]         # padded dim_in  (multiple of 128)
    no = packed["w2"].shape[1]         # padded dim_out (multiple of 128)

    # Batch tiling: 16-row aligned (bf16 sublane packing), aim for ~4 grid steps
    # so the activation stream pipelines and the batch axis is splittable across
    # the two v7x TensorCores.
    tb = min(tile_b, max(16, _round_up(pl.cdiv(B, 4), 16)))
    bp = _round_up(B, tb)
    if bp != B:
        x = jnp.pad(x, ((0, bp - B), (0, 0)))
        x_ext = jnp.pad(x_ext, ((0, bp - B), (0, 0)))
    grid = (bp // tb,)

    # Activations / outputs march over the batch grid; weights stay resident
    # (constant index_map -> fetched once, held in VMEM across all steps).
    act_x_spec = pl.BlockSpec((tb, dx), lambda i: (i, 0))
    act_e_spec = pl.BlockSpec((tb, de), lambda i: (i, 0))
    out_spec = pl.BlockSpec((tb, no), lambda i: (i, 0))

    def resident(shape):
        return pl.BlockSpec(shape, lambda i: (0, 0))

    weight_bytes = ((packed["wbx"].size + packed["wbe"].size
                     + packed["w1"].size + packed["w2"].size) * 2
                    + (packed["bb"].size + packed["b1"].size + packed["b2"].size) * 4)
    act_tile_bytes = tb * (dx + de) * 4
    out_tile_bytes = tb * no * 2
    # Double-buffered budget + margin; floor at the v5e default (16 MiB), cap
    # under v7x's 64 MiB per-TC physical VMEM.
    vmem_limit = int(min(max(2 * (weight_bytes + act_tile_bytes + out_tile_bytes)
                             + (4 << 20), 16 << 20), 48 << 20))

    flops = 2 * bp * ((dx + de) * di + di * di + di * no)
    bytes_accessed = bp * (dx + de) * 4 + weight_bytes + bp * no * 2

    out = pl.pallas_call(
        _survnet_kernel,
        out_shape=jax.ShapeDtypeStruct((bp, no), jnp.bfloat16),
        grid=grid,
        in_specs=[
            act_x_spec,                          # x      (tb, DX)   f32
            act_e_spec,                          # x_ext  (tb, DE)   f32
            resident(packed["wbx"].shape),       # Wb_x   (DX, DI)   bf16
            resident(packed["wbe"].shape),       # Wb_e   (DE, DI)   bf16
            resident(packed["bb"].shape),        # bb     (1, DI)    f32
            resident(packed["w1"].shape),        # W1     (DI, DI)   bf16
            resident(packed["b1"].shape),        # b1     (1, DI)    f32
            resident(packed["w2"].shape),        # W2     (DI, NO)   bf16
            resident(packed["b2"].shape),        # b2     (1, NO)    f32
        ],
        out_specs=out_spec,
        compiler_params=pltpu.CompilerParams(
            dimension_semantics=("parallel",),
            vmem_limit_bytes=vmem_limit),
        cost_estimate=pl.CostEstimate(
            flops=flops,
            transcendentals=bp * no,
            bytes_accessed=int(bytes_accessed)),
    )(x, x_ext, packed["wbx"], packed["wbe"], packed["bb"],
      packed["w1"], packed["b1"], packed["w2"], packed["b2"])

    # Padded rows / columns are garbage by construction and sliced away here.
    return out[:B, :dim_out]


def survnet_reference_f32(x, x_ext, params):
    """Pure-f32 JAX reference (original module math, eval mode)."""
    h = jnp.maximum(x @ params["wb_x"] + x_ext @ params["wb_e"] + params["bb"], 0.0)
    h1 = jnp.maximum(h @ params["w1"] + params["b1"], 0.0)
    return jax.nn.sigmoid(h1 @ params["w2"] + params["b2"])


def survnet_reference_matched(x, x_ext, params):
    """Reference mirroring the kernel's bf16-operand / f32-accumulate numerics."""
    bf = jnp.bfloat16
    h = (jnp.dot(x.astype(bf), params["wb_x"].astype(bf),
                 preferred_element_type=jnp.float32)
         + jnp.dot(x_ext.astype(bf), params["wb_e"].astype(bf),
                   preferred_element_type=jnp.float32)
         + params["bb"])
    h = jnp.maximum(h, 0.0)
    h1 = jnp.dot(h.astype(bf), params["w1"].astype(bf),
                 preferred_element_type=jnp.float32) + params["b1"]
    h1 = jnp.maximum(h1, 0.0)
    z = jnp.dot(h1.astype(bf), params["w2"].astype(bf),
                preferred_element_type=jnp.float32) + params["b2"]
    return jax.nn.sigmoid(z)


def init_params(key, dim_x, dim_ext, dim_in, dim_out):
    ks = jax.random.split(key, 6)
    scale = 0.1
    return {
        "wb_x": scale * jax.random.normal(ks[0], (dim_x, dim_in), jnp.float32),
        "wb_e": scale * jax.random.normal(ks[1], (dim_ext, dim_in), jnp.float32),
        "bb":   jnp.zeros((1, dim_in), jnp.float32),
        "w1":   scale * jax.random.normal(ks[2], (dim_in, dim_in), jnp.float32),
        "b1":   scale * jax.random.normal(ks[3], (1, dim_in), jnp.float32),
        "w2":   scale * jax.random.normal(ks[4], (dim_in, dim_out), jnp.float32),
        "b2":   scale * jax.random.normal(ks[5], (1, dim_out), jnp.float32),
    }


if __name__ == "__main__":
    # Small, module-consistent shapes: batch=64, x feats=16, x_ext feats=16,
    # backbone hidden dim_in=32, survival time bins dim_out=8.
    # Default tile policy gives tb=16 -> grid=(4,), exercising the pipelined path.
    B, DX, DE, DIM_IN, DIM_OUT = 64, 16, 16, 32, 8

    key = jax.random.PRNGKey(0)
    kx, ke, kp = jax.random.split(key, 3)
    x = jax.random.normal(kx, (B, DX), jnp.float32)
    x_ext = jax.random.normal(ke, (B, DE), jnp.float32)
    params = init_params(kp, DX, DE, DIM_IN, DIM_OUT)

    # One-time weight packing (bf16 + lane-dense padding), outside the hot path.
    packed, dim_out = pack_params(params)

    out = survnet_forward(x, x_ext, packed, dim_out=dim_out)
    out = jax.block_until_ready(out)
    assert out.shape == (B, DIM_OUT)
    assert out.dtype == jnp.bfloat16
    out_f32 = out.astype(jnp.float32)

    # Check vs. a reference with identical bf16-operand numerics (slack only for
    # the final bf16 output rounding, ~2^-9 near 0.5).
    ref_matched = survnet_reference_matched(x, x_ext, params)
    assert jnp.allclose(out_f32, ref_matched, atol=5e-3, rtol=1e-2), \
        "mismatch vs bf16-matched reference"

    # Loose check vs. the pure-f32 module math (bf16 operand + output rounding).
    ref_f32 = survnet_reference_f32(x, x_ext, params)
    assert jnp.allclose(out_f32, ref_f32, atol=2.5e-2, rtol=2.5e-2), \
        "mismatch vs f32 reference"

    print("KERNEL_OK")
</pallas_src>

<mosaic_0001>
module attributes {stable_mosaic.version = 11 : i64} {
  func.func @_survnet_kernel(%arg0: i32, %arg1: memref<16x16xf32, #tpu.memory_space<vmem>>, %arg2: memref<16x16xf32, #tpu.memory_space<vmem>>, %arg3: memref<16x128xbf16, #tpu.memory_space<vmem>>, %arg4: memref<16x128xbf16, #tpu.memory_space<vmem>>, %arg5: memref<1x128xf32, #tpu.memory_space<vmem>>, %arg6: memref<128x128xbf16, #tpu.memory_space<vmem>>, %arg7: memref<1x128xf32, #tpu.memory_space<vmem>>, %arg8: memref<128x128xbf16, #tpu.memory_space<vmem>>, %arg9: memref<1x128xf32, #tpu.memory_space<vmem>>, %arg10: memref<16x128xbf16, #tpu.memory_space<vmem>>) attributes {dimension_semantics = [#tpu.dimension_semantics<parallel>], iteration_bounds = array<i64: 4>, scalar_prefetch = 0 : i64, scratch_operands = 0 : i64, tpu.core_type = #tpu.core_type<tc>, window_params = [{transform_indices = @transform_0, window_bounds = array<i64: 16, 16>}, {transform_indices = @transform_1, window_bounds = array<i64: 16, 16>}, {pipeline_mode = #tpu.pipeline_mode<synchronous>, transform_indices = @transform_2, window_bounds = array<i64: 16, 128>}, {pipeline_mode = #tpu.pipeline_mode<synchronous>, transform_indices = @transform_3, window_bounds = array<i64: 16, 128>}, {pipeline_mode = #tpu.pipeline_mode<synchronous>, transform_indices = @transform_4, window_bounds = array<i64: 1, 128>}, {pipeline_mode = #tpu.pipeline_mode<synchronous>, transform_indices = @transform_5, window_bounds = array<i64: 128, 128>}, {pipeline_mode = #tpu.pipeline_mode<synchronous>, transform_indices = @transform_6, window_bounds = array<i64: 1, 128>}, {pipeline_mode = #tpu.pipeline_mode<synchronous>, transform_indices = @transform_7, window_bounds = array<i64: 128, 128>}, {pipeline_mode = #tpu.pipeline_mode<synchronous>, transform_indices = @transform_8, window_bounds = array<i64: 1, 128>}, {transform_indices = @transform_9, window_bounds = array<i64: 16, 128>}]} {
    %c0 = arith.constant 0 : index
    %c0_0 = arith.constant 0 : index
    %0 = vector.load %arg1[%c0, %c0_0] : memref<16x16xf32, #tpu.memory_space<vmem>>, vector<16x16xf32>
    %1 = arith.truncf %0 : vector<16x16xf32> to vector<16x16xbf16>
    %c0_1 = arith.constant 0 : index
    %c0_2 = arith.constant 0 : index
    %2 = vector.load %arg2[%c0_1, %c0_2] : memref<16x16xf32, #tpu.memory_space<vmem>>, vector<16x16xf32>
    %3 = arith.truncf %2 : vector<16x16xf32> to vector<16x16xbf16>
    %c0_3 = arith.constant 0 : index
    %c0_4 = arith.constant 0 : index
    %4 = vector.load %arg3[%c0_3, %c0_4] : memref<16x128xbf16, #tpu.memory_space<vmem>>, vector<16x128xbf16>
    %cst = arith.constant dense<0.000000e+00> : vector<16x128xf32>
    %5 = tpu.matmul %1, %4, %cst {dimension_numbers = #tpu.dot_dimension_numbers<[1], [0], [0], [1], [0, 0, 1, 1], [], []>} : vector<16x16xbf16>, vector<16x128xbf16>, vector<16x128xf32> -> vector<16x128xf32>
    %c0_5 = arith.constant 0 : index
    %c0_6 = arith.constant 0 : index
    %6 = vector.load %arg4[%c0_5, %c0_6] : memref<16x128xbf16, #tpu.memory_space<vmem>>, vector<16x128xbf16>
    %cst_7 = arith.constant dense<0.000000e+00> : vector<16x128xf32>
    %7 = tpu.matmul %3, %6, %cst_7 {dimension_numbers = #tpu.dot_dimension_numbers<[1], [0], [0], [1], [0, 0, 1, 1], [], []>} : vector<16x16xbf16>, vector<16x128xbf16>, vector<16x128xf32> -> vector<16x128xf32>
    %8 = arith.addf %5, %7 : vector<16x128xf32>
    %c0_8 = arith.constant 0 : index
    %c0_9 = arith.constant 0 : index
    %9 = vector.load %arg5[%c0_8, %c0_9] : memref<1x128xf32, #tpu.memory_space<vmem>>, vector<1x128xf32>
    %10 = vector.broadcast %9 : vector<1x128xf32> to vector<16x128xf32>
    %11 = arith.addf %8, %10 : vector<16x128xf32>
    %cst_10 = arith.constant 0.000000e+00 : f32
    %12 = vector.broadcast %cst_10 : f32 to vector<16x128xf32>
    %13 = arith.maximumf %11, %12 : vector<16x128xf32>
    %14 = arith.truncf %13 : vector<16x128xf32> to vector<16x128xbf16>
    %c0_11 = arith.constant 0 : index
    %c0_12 = arith.constant 0 : index
    %15 = vector.load %arg6[%c0_11, %c0_12] : memref<128x128xbf16, #tpu.memory_space<vmem>>, vector<128x128xbf16>
    %cst_13 = arith.constant dense<0.000000e+00> : vector<16x128xf32>
    %16 = tpu.matmul %14, %15, %cst_13 {dimension_numbers = #tpu.dot_dimension_numbers<[1], [0], [0], [1], [0, 0, 1, 1], [], []>} : vector<16x128xbf16>, vector<128x128xbf16>, vector<16x128xf32> -> vector<16x128xf32>
    %c0_14 = arith.constant 0 : index
    %c0_15 = arith.constant 0 : index
    %17 = vector.load %arg7[%c0_14, %c0_15] : memref<1x128xf32, #tpu.memory_space<vmem>>, vector<1x128xf32>
    %18 = vector.broadcast %17 : vector<1x128xf32> to vector<16x128xf32>
    %19 = arith.addf %16, %18 : vector<16x128xf32>
    %cst_16 = arith.constant 0.000000e+00 : f32
    %20 = vector.broadcast %cst_16 : f32 to vector<16x128xf32>
    %21 = arith.maximumf %19, %20 : vector<16x128xf32>
    %22 = arith.truncf %21 : vector<16x128xf32> to vector<16x128xbf16>
    %c0_17 = arith.constant 0 : index
    %c0_18 = arith.constant 0 : index
    %23 = vector.load %arg8[%c0_17, %c0_18] : memref<128x128xbf16, #tpu.memory_space<vmem>>, vector<128x128xbf16>
    %cst_19 = arith.constant dense<0.000000e+00> : vector<16x128xf32>
    %24 = tpu.matmul %22, %23, %cst_19 {dimension_numbers = #tpu.dot_dimension_numbers<[1], [0], [0], [1], [0, 0, 1, 1], [], []>} : vector<16x128xbf16>, vector<128x128xbf16>, vector<16x128xf32> -> vector<16x128xf32>
    %c0_20 = arith.constant 0 : index
    %c0_21 = arith.constant 0 : index
    %25 = vector.load %arg9[%c0_20, %c0_21] : memref<1x128xf32, #tpu.memory_space<vmem>>, vector<1x128xf32>
    %26 = vector.broadcast %25 : vector<1x128xf32> to vector<16x128xf32>
    %27 = arith.addf %24, %26 : vector<16x128xf32>
    %28 = arith.negf %27 : vector<16x128xf32>
    %29 = math.exp %28 : vector<16x128xf32>
    %cst_22 = arith.constant 1.000000e+00 : f32
    %30 = vector.broadcast %cst_22 : f32 to vector<16x128xf32>
    %31 = arith.addf %30, %29 : vector<16x128xf32>
    %32 = arith.divf %30, %31 : vector<16x128xf32>
    %33 = arith.truncf %32 : vector<16x128xf32> to vector<16x128xbf16>
    %c0_23 = arith.constant 0 : index
    %c0_24 = arith.constant 0 : index
    %34 = vector.load %arg10[%c0_23, %c0_24] : memref<16x128xbf16, #tpu.memory_space<vmem>>, vector<16x128xbf16>
    tpu.vector_store %arg10[%c0_23, %c0_24], %33 {strides = array<i32>} : memref<16x128xbf16, #tpu.memory_space<vmem>>, vector<16x128xbf16>,
    return
  }
  func.func @transform_0(%arg0: i32) -> (i32, i32) {
    %c0_i32 = arith.constant 0 : i32
    %c0_i32_0 = arith.constant 0 : i32
    return %arg0, %c0_i32 : i32, i32
  }
  func.func @transform_1(%arg0: i32) -> (i32, i32) {
    %c0_i32 = arith.constant 0 : i32
    %c0_i32_0 = arith.constant 0 : i32
    return %arg0, %c0_i32 : i32, i32
  }
  func.func @transform_2(%arg0: i32) -> (i32, i32) {
    %c0_i32 = arith.constant 0 : i32
    %c0_i32_0 = arith.constant 0 : i32
    %c0_i32_1 = arith.constant 0 : i32
    return %c0_i32, %c0_i32_0 : i32, i32
  }
  func.func @transform_3(%arg0: i32) -> (i32, i32) {
    %c0_i32 = arith.constant 0 : i32
    %c0_i32_0 = arith.constant 0 : i32
    %c0_i32_1 = arith.constant 0 : i32
    return %c0_i32, %c0_i32_0 : i32, i32
  }
  func.func @transform_4(%arg0: i32) -> (i32, i32) {
    %c0_i32 = arith.constant 0 : i32
    %c0_i32_0 = arith.constant 0 : i32
    %c0_i32_1 = arith.constant 0 : i32
    return %c0_i32, %c0_i32_0 : i32, i32
  }
  func.func @transform_5(%arg0: i32) -> (i32, i32) {
    %c0_i32 = arith.constant 0 : i32
    %c0_i32_0 = arith.constant 0 : i32
    %c0_i32_1 = arith.constant 0 : i32
    return %c0_i32, %c0_i32_0 : i32, i32
  }
  func.func @transform_6(%arg0: i32) -> (i32, i32) {
    %c0_i32 = arith.constant 0 : i32
    %c0_i32_0 = arith.constant 0 : i32
    %c0_i32_1 = arith.constant 0 : i32
    return %c0_i32, %c0_i32_0 : i32, i32
  }
  func.func @transform_7(%arg0: i32) -> (i32, i32) {
    %c0_i32 = arith.constant 0 : i32
    %c0_i32_0 = arith.constant 0 : i32
    %c0_i32_1 = arith.constant 0 : i32
    return %c0_i32, %c0_i32_0 : i32, i32
  }
  func.func @transform_8(%arg0: i32) -> (i32, i32) {
    %c0_i32 = arith.constant 0 : i32
    %c0_i32_0 = arith.constant 0 : i32
    %c0_i32_1 = arith.constant 0 : i32
    return %c0_i32, %c0_i32_0 : i32, i32
  }
  func.func @transform_9(%arg0: i32) -> (i32, i32) {
    %c0_i32 = arith.constant 0 : i32
    %c0_i32_0 = arith.constant 0 : i32
    return %arg0, %c0_i32 : i32, i32
  }
}

</mosaic_0001>

<bundles_post_ra>
// kernel: survnet_forward.1
= control target key start
LH: loop header
LB: loop body
LE: loop exit
PB: predicated region body
PF: predicated region fallthrough
CT: control target
= control target key end

     0   :  { %s1016_s30 = smov 0   ;;  %s1129_s0 = inlined_call_operand.vmem [shape: f32[64,16], index: 0, kind: input, shape index: {}]   ;;  %s1130_s1 = inlined_call_operand.vmem [shape: f32[64,16], index: 1, kind: input, shape index: {}]   ;;  %s1131_s2 = inlined_call_operand.vmem [shape: bf16[16,128], index: 2, kind: input, shape index: {}]   ;;  %s1132_s3 = inlined_call_operand.vmem [shape: bf16[16,128], index: 3, kind: input, shape index: {}]   ;;  %s1133_s4 = inlined_call_operand.vmem [shape: f32[1,128], index: 4, kind: input, shape index: {}]   ;;  %s1134_s5 = inlined_call_operand.vmem [shape: bf16[128,128], index: 5, kind: input, shape index: {}]   ;;  %s1135_s6 = inlined_call_operand.vmem [shape: f32[1,128], index: 6, kind: input, shape index: {}]   ;;  %s1136_s7 = inlined_call_operand.vmem [shape: bf16[128,128], index: 7, kind: input, shape index: {}]   ;;  %s1137_s8 = inlined_call_operand.vmem [shape: f32[1,128], index: 8, kind: input, shape index: {}]   ;;  %s1138_s9 = inlined_call_operand.vmem [shape: bf16[64,128], index: 9, kind: output, shape index: {}]  }
   0x1 LB: > { %s799_s10 = sadd.s32 4294967295, %s962_s30   ;;  %p803_p0 = scmp.ge.s32.totalorder %s962_s30, 1  ;;  %s962_s30 = sphi %s1016_s30, %s19_s30  }
   0x2   : > { %p299_p1 = scmp.lt.s32.totalorder %s962_s30, 5 }
   0x4   : > { %p300_p2 = pnand %p803_p0, %p299_p1 }
   0x5   : > { %v930_v0 = vld [vmem:[%s1132_s3] sm:$0xff] (!%p300_p2)   ;;  %v964_v1 = vmov (!%p300_p2), 0.0   ;;  %vm965_vm0 = vmmov (!%p300_p2), 0   ;;  %s804_s15 = sshll.u32 (!%p300_p2), %s799_s10, 1  ;;  %vm375_vm1 = vcmask (!%p300_p2), 130048   ;;  %v933_v10 = vld [vmem:[%s1134_s5 + $0x8] sm:$0xff] (!%p300_p2)  }
   0x6   : > { %303 = sbr.rel (%p300_p2) target bundleno = 707 (0x2c3), region = 56  ;;  %868 = vmatprep.subr.bf16.mxu0 (!%p300_p2), %v964_v1  ;;  %874 = vmatprep.subr.bf16.mxu1 (!%p300_p2), %v964_v1  ;;  %v931_v2 = vld [vmem:[%s1131_s2] sm:$0xff] (!%p300_p2)   ;;  %p341_p3 = scmp.lt.s32.totalorder (!%p300_p2), %s804_s15, 7  ;;  %v934_v11 = vld [vmem:[%s1134_s5 + $0x10] sm:$0xff] (!%p300_p2)   ;;  %v935_v12 = vld [vmem:[%s1134_s5 + $0x18] sm:$0xff] (!%p300_p2)  }
   0x7   : > { %869 = vmatpush3.bf16.msra.mxu0 (!%p300_p2), %v930_v0  ;;  %870 = vmatprep.mubr.msk.bf16.mxu0 (!%p300_p2), %vm965_vm0, %v964_v1  ;;  %v932_v3 = vld [vmem:[%s1134_s5] sm:$0xff] (!%p300_p2)   ;;  %v937_v14 = vld [vmem:[%s1134_s5 + $0x28] sm:$0xff] (!%p300_p2)   ;;  %v938_v15 = vld [vmem:[%s1134_s5 + $0x30] sm:$0xff] (!%p300_p2)  }
   0x8   : > { %875 = vmatpush3.bf16.msra.mxu1 (!%p300_p2), %v931_v2  ;;  %876 = vmatprep.mubr.msk.bf16.mxu1 (!%p300_p2), %vm965_vm0, %v964_v1  ;;  %v936_v13 = vld [vmem:[%s1134_s5 + $0x20] sm:$0xff] (!%p300_p2)   ;;  %v939_v16 = vld [vmem:[%s1134_s5 + $0x38] sm:$0xff] (!%p300_p2)   ;;  %v941_v18 = vld [vmem:[%s1136_s7 + $0x8] sm:$0xff] (!%p300_p2)  }
   0x9   : > { %880 = vmatprep.subr.bf16.mxu0 (!%p300_p2), %v964_v1  ;;  %900 = vmatprep.subr.bf16.mxu1 (!%p300_p2), %v964_v1  ;;  %v940_v17 = vld [vmem:[%s1136_s7] sm:$0xff] (!%p300_p2)   ;;  %v942_v19 = vld [vmem:[%s1136_s7 + $0x10] sm:$0xff] (!%p300_p2)   ;;  %v943_v20 = vld [vmem:[%s1136_s7 + $0x18] sm:$0xff] (!%p300_p2)  }
   0xa   : > { %v944_v21 = vld [vmem:[%s1136_s7 + $0x20] sm:$0xff] (!%p300_p2)   ;;  %v945_v22 = vld [vmem:[%s1136_s7 + $0x28] sm:$0xff] (!%p300_p2)   ;;  %v946_v39 = vld [vmem:[%s1136_s7 + $0x30] sm:$0xff] (!%p300_p2)  }
   0xb   : > { %v814_v25 = vld [vmem:[%s1133_s4] ss:$0 sm:$0xff] (!%p300_p2)  ;;  %v947_v40 = vld [vmem:[%s1136_s7 + $0x38] sm:$0xff] (!%p300_p2)  }
   0xc   : > { %v815_v41 = vld [vmem:[%s1135_s6] ss:$0 sm:$0xff] (!%p300_p2) }
   0xd   : > { %s1140_s15 = smov (!%p341_p3, %s804_s15), 7  ;;  %v824_v51 = vld [vmem:[%s1137_s8] ss:$0 sm:$0xff] }
   0xe   : > { %s805_s16 = sshll.u32 %s1140_s15, 3  ;;  %s809_s23 = sshll.u32 %s1140_s15, 2 }
   0xf   : > { %s350_s21 = scalar_lea.vmem %s1130_s1, %s805_s16  ;;  %s344_s24 = scalar_lea.vmem %s1129_s0, %s805_s16 }
  0x10   : > { %v362_v4 = vld [vmem:[%s350_s21] sm:$0xff]  ;;  %v363_v5 = vld [vmem:[%s350_s21 + $0x8] sm:$0xff]  ;;  %s356_s26 = scalar_lea.vmem %s1138_s9, %s809_s23 }
  0x11   : > { %v364_v6 = vpack.c.bf16 %v363_v5, %v362_v4  ;;  %v359_v7 = vld [vmem:[%s344_s24] sm:$0xff]  ;;  %v360_v8 = vld [vmem:[%s344_s24 + $0x8] sm:$0xff] }
  0x12   : > { %v361_v9 = vpack.c.bf16 %v360_v8, %v359_v7 }
  0x13   : > { %871 = vmatmul.mubr.msk.bf16.vlgmr.msra.gmra.mrb[0].mxu0 %vm375_vm1, %v364_v6 }
  0x14   : > { %877 = vmatmul.mubr.msk.bf16.vlgmr.msra.gmra.mrb[0].mxu1 %vm375_vm1, %v361_v9  ;;  %881 = vmatpush3.bf16.msra.mxu0 %v932_v3 }
  0x15   : > { %882 = vmatprep.subr.bf16.mxu0 %v964_v1  ;;  %896 = vmatprep.mubr.msk.bf16.mxu0 %vm965_vm0, %v964_v1 }
  0x16   : > { %916 = vmatprep.mubr.msk.bf16.mxu1 %vm965_vm0, %v964_v1  ;;  %901 = vmatpush3.bf16.msra.mxu1 %v940_v17 }
  0x17   : > { %902 = vmatprep.subr.bf16.mxu1 %v964_v1 }
  0x18   : > { %883 = vmatpush3.bf16.msra.mxu0 %v933_v10 }
  0x19   : > { %884 = vmatprep.subr.bf16.mxu0 %v964_v1 }
  0x1a   : > { %903 = vmatpush3.bf16.msra.mxu1 %v941_v18 }
  0x1b   : > { %904 = vmatprep.subr.bf16.mxu1 %v964_v1 }
  0x1c   : > { %885 = vmatpush3.bf16.msra.mxu0 %v934_v11 }
  0x1d   : > { %886 = vmatprep.subr.bf16.mxu0 %v964_v1 }
  0x1e   : > { %905 = vmatpush3.bf16.msra.mxu1 %v942_v19 }
  0x1f   : > { %906 = vmatprep.subr.bf16.mxu1 %v964_v1 }
  0x20   : > { %887 = vmatpush3.bf16.msra.mxu0 %v935_v12 }
  0x21   : > { %888 = vmatprep.subr.bf16.mxu0 %v964_v1 }
  0x22   : > { %907 = vmatpush3.bf16.msra.mxu1 %v943_v20 }
  0x23   : > { %908 = vmatprep.subr.bf16.mxu1 %v964_v1 }
  0x24   : > { %889 = vmatpush3.bf16.msra.mxu0 %v936_v13 }
  0x25   : > { %890 = vmatprep.subr.bf16.mxu0 %v964_v1 }
  0x26   : > { %909 = vmatpush3.bf16.msra.mxu1 %v944_v21 }
  0x27   : > { %910 = vmatprep.subr.bf16.mxu1 %v964_v1 }
  0x28   : > { %891 = vmatpush3.bf16.msra.mxu0 %v937_v14 }
  0x29   : > { %892 = vmatprep.subr.bf16.mxu0 %v964_v1 }
  0x2a   : > { %911 = vmatpush3.bf16.msra.mxu1 %v945_v22 }
  0x2b   : > { %912 = vmatprep.subr.bf16.mxu1 %v964_v1 }
  0x2c   : > { %893 = vmatpush3.bf16.msra.mxu0 %v938_v15 }
  0x2d   : > { %894 = vmatprep.subr.bf16.mxu0 %v964_v1 }
  0x2e   : > { %913 = vmatpush3.bf16.msra.mxu1 %v946_v39 }
  0x2f   : > { %914 = vmatprep.subr.bf16.mxu1 %v964_v1 }
  0x30   : > { %895 = vmatpush3.bf16.msra.mxu0 %v939_v16 }
  0x32   : > { %915 = vmatpush3.bf16.msra.mxu1 %v947_v40 }
  0xe6   : > { %v413_v23 = vpop.f32.mrb[0].mxu0 }
  0xe7   : > { %v463_v24 = vpop.f32.mrb[0].mxu1  ;;  %v872_v26 = vpop.f32.mrb[1].mxu0 }
  0xe8   : > { %v464_v27 = vadd.f32 %v463_v24, %v413_v23  ;;  %v878_v28 = vpop.f32.mrb[1].mxu1  ;;  %v416_v29 = vpop.f32.mrb[2].mxu0 }
  0xe9   : > { %v466_v30 = vpop.f32.mrb[2].mxu1  ;;  %v873_v31 = vpop.f32.mrb[3].mxu0 }
  0xea   : > { %v477_v32 = vadd.f32 %v814_v25, %v464_v27  ;;  %v467_v33 = vadd.f32 %v466_v30, %v416_v29  ;;  %v879_v34 = vpop.f32.mrb[3].mxu1 }
  0xec   : > { %v478_v35 = vadd.f32 %v814_v25, %v467_v33  ;;  %v479_v36 = vmax.f32 %v477_v32, 0.0 }
  0xee   : > { %v480_v37 = vmax.f32 %v478_v35, 0.0 }
  0xf0   : > { %v481_v38 = vpack.c.bf16 %v480_v37, %v479_v36 }
  0xf2   : > { %897 = vmatmul.mubr.bf16.vlgmr.msra.gmra.mrb[4].mxu0 %v481_v38 }
 0x1c5   : > { %v587_v42 = vpop.f32.mrb[4].mxu0 }
 0x1c6   : > { %v588_v43 = vadd.f32 %v815_v41, %v587_v42  ;;  %v898_v44 = vpop.f32.mrb[5].mxu0 }
 0x1c7   : > { %v590_v45 = vpop.f32.mrb[6].mxu0 }
 0x1c8   : > { %v591_v46 = vadd.f32 %v815_v41, %v590_v45  ;;  %v899_v47 = vpop.f32.mrb[7].mxu0  ;;  %v594_v48 = vmax.f32 %v588_v43, 0.0 }
 0x1ca   : > { %v595_v49 = vmax.f32 %v591_v46, 0.0 }
 0x1cc   : > { %v596_v50 = vpack.c.bf16 %v595_v49, %v594_v48 }
 0x1ce   : > { %917 = vmatmul.mubr.bf16.vlgmr.msra.gmra.mrb[4].mxu1 %v596_v50 }
 0x2a1   : > { %v702_v52 = vpop.f32.mrb[4].mxu1 }
 0x2a2   : > { %v703_v53 = vadd.f32 %v824_v51, %v702_v52  ;;  %v918_v54 = vpop.f32.mrb[5].mxu1 }
 0x2a3   : > { %v705_v55 = vpop.f32.mrb[6].mxu1 }
 0x2a4   : > { %v833_v56 = vmul.f32 -1.442695, %v703_v53  ;;  %v706_v57 = vadd.f32 %v824_v51, %v705_v55  ;;  %v919_v58 = vpop.f32.mrb[7].mxu1 }
 0x2a6   : > { %948 = vpow2.f32 %v833_v56  ;;  %v834_v59 = vmul.f32 -1.442695, %v706_v57 }
 0x2a8   : > { %950 = vpow2.f32 %v834_v59 }
 0x2b0   : > { %v949_v60 = vpop.eup %948 }
 0x2b1   : > { %v715_v61 = vadd.f32 1.0, %v949_v60 }
 0x2b2   : > { %v951_v62 = vpop.eup %950 }
 0x2b3   : > { %v716_v63 = vadd.f32 1.0, %v951_v62  ;;  %952 = vrcp.f32 %v715_v61 }
 0x2b5   : > { %954 = vrcp.f32 %v716_v63 }
 0x2bd   : > { %v953_v0 = vpop.eup %952 }
 0x2bf   : > { %v955_v1 = vpop.eup %954 }
 0x2c0   : > { %v844_v2 = vpack.c.bf16 %v955_v1, %v953_v0 }
 0x2c2   : > { %845 = vst [vmem:[%s356_s26] sm:$0xff] %v844_v2  }
 0x2c3 PF: > { %s19_s30 = sadd.s32 1, %s962_s30  }
 0x2c4   : > { %p16_p4 = scmp.ge.s32.totalorder %s19_s30, 6  }
 0x2c6   :  { %18 = sbr.rel (!%p16_p4) target bundleno = 1 (0x1), region = 89 }

</bundles_post_ra>
